<compile_context>
chip_gen: v5e
topology: v5e:2x2
jax: 0.10.0
libtpu: 0.0.40
codegen_flags: <defaults>
</compile_context>

<pallas_src>
import functools
import numpy as np
import jax
import jax.numpy as jnp
from jax import lax
from jax.experimental import pallas as pl
from jax.experimental.pallas import tpu as pltpu


def _round_up(x, m):
    return (x + m - 1) // m * m


def _ppo_kernel(x_ref, w1_ref, w2_ref, wh1_ref, wh2_ref, bias_ref, out_ref,
                *, h1, h2, hh, out_pad, action_size):
    """Fused PPO forward: shared trunk + fused (actor||critic) heads.

    Writes one lane-dense (bm, out_pad) slab:
      lanes [0, action_size)  -> softmax action probabilities
      lane  action_size       -> state value
      remaining lanes         -> zeros (padding)
    """
    cd = w1_ref.dtype                       # compute dtype (bf16 by default)
    x = x_ref[...]                          # already cast to cd in the wrapper
    b_all = bias_ref[...]                   # biases stay f32 (added to f32 acc)
    b1 = b_all[0:1, 0:h1]
    b2 = b_all[1:2, 0:h2]
    bh1 = b_all[2:3, 0:hh]
    bh2 = b_all[3:4, 0:out_pad]

    # ---- shared trunk (Dropout(0.1) == identity in eval mode) ---------------
    h = jnp.dot(x, w1_ref[...], preferred_element_type=jnp.float32) + b1
    h = jnp.maximum(h, 0.0).astype(cd)
    h = jnp.dot(h, w2_ref[...], preferred_element_type=jnp.float32) + b2
    h = jnp.maximum(h, 0.0).astype(cd)

    # ---- fused heads, layer 1: [actor_hidden | critic_hidden] ---------------
    g = jnp.dot(h, wh1_ref[...], preferred_element_type=jnp.float32) + bh1
    g = jnp.maximum(g, 0.0).astype(cd)

    # ---- fused heads, layer 2: block-diag [wa2 0; 0 wc2] padded to out_pad --
    y = jnp.dot(g, wh2_ref[...], preferred_element_type=jnp.float32) + bh2  # (bm, out_pad) f32

    lane = lax.broadcasted_iota(jnp.int32, y.shape, 1)
    logits = jnp.where(lane < action_size, y, -jnp.inf)       # mask padded logit lanes
    m = jnp.max(logits, axis=-1, keepdims=True)
    e = jnp.exp(logits - m)                                    # exp(-inf) == 0 on padding
    denom = jnp.sum(e, axis=-1, keepdims=True)
    # Exact reciprocal: probs feed PPO ratios / log-probs / entropy.
    probs = e * pl.reciprocal(denom, approx=False)

    # probs are exactly 0 on all lanes >= action_size; drop the value into lane A.
    out_ref[...] = jnp.where(lane == action_size, y, probs).astype(out_ref.dtype)


def _vmem_limit_bytes(bm, state_dim, dims, weight_arrays, in_itemsize, out_itemsize):
    """Explicit scoped-VMEM budget: resident weights (single-buffered) +
    double-buffered input/output tiles + live f32 intermediates, with headroom."""
    weight_bytes = sum(int(np.prod(w.shape)) * w.dtype.itemsize for w in weight_arrays)
    io_bytes = 2 * bm * state_dim * in_itemsize + 2 * bm * dims["out_pad"] * out_itemsize
    wmax = max(dims["h1"], dims["h2"], dims["hh"], dims["out_pad"])
    interm_bytes = 6 * bm * wmax * 4          # generous: a handful of live f32 temps
    footprint = weight_bytes + io_bytes + interm_bytes
    limit = int(1.25 * footprint) + (4 << 20)
    return int(min(max(limit, 32 << 20), 100 << 20))


def ppo_forward(state, packed, *, block_batch=1024, out_dtype=jnp.float32):
    """Fused PPO actor-critic forward. state: (B, state_size) f32 -> (probs, value)."""
    dims = packed["dims"]
    A = dims["action_size"]
    out_pad = dims["out_pad"]
    B, S = state.shape

    w1 = packed["w1"]
    w2 = packed["w2"]
    wh1 = packed["wh1"]
    wh2 = packed["wh2"]
    biases = packed["biases"]
    compute_dtype = w1.dtype

    # Row alignment: 16 for bf16 activations (sublane packing), 8 for f32.
    align = 16 if compute_dtype == jnp.bfloat16 else 8

    # Big batch tiles (default up to 1024) amortize per-step pipeline overhead,
    # but keep >= 2 grid steps when possible so the "parallel" batch axis can
    # shard across v7x's two TensorCores.
    bm = min(block_batch, _round_up(B, align))
    if B >= 2 * align:
        bm = min(bm, _round_up((B + 1) // 2, align))
    bm = max(bm, align)
    Bp = _round_up(B, bm)

    x = state.astype(compute_dtype)
    if Bp != B:
        x = jnp.pad(x, ((0, Bp - B), (0, 0)))

    kernel = functools.partial(
        _ppo_kernel,
        h1=dims["h1"], h2=dims["h2"], hh=dims["hh"],
        out_pad=out_pad, action_size=A)

    vmem_limit = _vmem_limit_bytes(
        bm, S, dims, (w1, w2, wh1, wh2, biases),
        in_itemsize=x.dtype.itemsize,
        out_itemsize=jnp.dtype(out_dtype).itemsize)

    resident = pl.Buffered(1)   # grid-invariant operands: no double buffering

    out = pl.pallas_call(
        kernel,
        grid=(Bp // bm,),
        in_specs=[
            pl.BlockSpec((bm, S), lambda i: (i, 0)),                              # batch-tiled
            pl.BlockSpec(w1.shape, lambda i: (0, 0), pipeline_mode=resident),     # resident
            pl.BlockSpec(w2.shape, lambda i: (0, 0), pipeline_mode=resident),
            pl.BlockSpec(wh1.shape, lambda i: (0, 0), pipeline_mode=resident),
            pl.BlockSpec(wh2.shape, lambda i: (0, 0), pipeline_mode=resident),
            pl.BlockSpec(biases.shape, lambda i: (0, 0), pipeline_mode=resident),
        ],
        out_specs=pl.BlockSpec((bm, out_pad), lambda i: (i, 0)),
        out_shape=jax.ShapeDtypeStruct((Bp, out_pad), out_dtype),
        compiler_params=pltpu.CompilerParams(
            dimension_semantics=("parallel",),
            vmem_limit_bytes=vmem_limit),
    )(x, w1, w2, wh1, wh2, biases)

    probs = out[:B, :A]
    value = out[:B, A:A + 1]
    return probs, value


def init_params(key, state_size, action_size, hidden_sizes):
    """Deterministic init mirroring PPONetwork.__init__ (orthogonal gain sqrt(2), zero bias)."""
    h1, h2 = hidden_sizes
    ha = hidden_sizes[-1] // 2
    ortho = jax.nn.initializers.orthogonal(scale=float(np.sqrt(2.0)))
    keys = jax.random.split(key, 6)

    def lin(k, fan_in, fan_out):
        # stored as (in, out) so the kernel does x @ W + b
        w = ortho(k, (fan_in, fan_out), jnp.float32)
        b = jnp.zeros((1, fan_out), jnp.float32)
        return w, b

    w1, b1 = lin(keys[0], state_size, h1)
    w2, b2 = lin(keys[1], h1, h2)
    wa1, ba1 = lin(keys[2], h2, ha)
    wa2, ba2 = lin(keys[3], ha, action_size)
    wc1, bc1 = lin(keys[4], h2, ha)
    wc2, bc2 = lin(keys[5], ha, 1)
    return dict(w1=w1, b1=b1, w2=w2, b2=b2,
                wa1=wa1, ba1=ba1, wa2=wa2, ba2=ba2,
                wc1=wc1, bc1=bc1, wc2=wc2, bc2=bc2)


def pack_params(params, action_size, *, compute_dtype=jnp.bfloat16):
    """Build the fused / lane-dense operands consumed by the kernel.

    Matmul weights are stored in `compute_dtype` (bf16 by default: half the
    resident VMEM, full MXU bf16 rate); biases stay f32 (added to f32 acc)."""
    h1 = params["w1"].shape[1]
    h2 = params["w2"].shape[1]
    ha = params["wa1"].shape[1]
    hh = 2 * ha
    A = action_size
    out_pad = max(128, _round_up(A + 1, 128))

    # Head layer 1: [wa1 | wc1] -> one lane-dense matmul producing (B, hh).
    wh1 = jnp.concatenate([params["wa1"], params["wc1"]], axis=1)           # (h2, hh)

    # Head layer 2: block-diagonal [wa2 0; 0 wc2] padded to out_pad lanes.
    wh2 = jnp.zeros((hh, out_pad), jnp.float32)
    wh2 = wh2.at[:ha, :A].set(params["wa2"])
    wh2 = wh2.at[ha:, A:A + 1].set(params["wc2"])

    # All six biases packed into one (4, Wmax) slab (one DMA descriptor).
    wmax = max(h1, h2, hh, out_pad)
    biases = jnp.zeros((4, wmax), jnp.float32)
    biases = biases.at[0, :h1].set(params["b1"][0])
    biases = biases.at[1, :h2].set(params["b2"][0])
    biases = biases.at[2, :ha].set(params["ba1"][0])
    biases = biases.at[2, ha:hh].set(params["bc1"][0])
    biases = biases.at[3, :A].set(params["ba2"][0])
    biases = biases.at[3, A].set(params["bc2"][0, 0])

    return dict(w1=params["w1"].astype(compute_dtype),
                w2=params["w2"].astype(compute_dtype),
                wh1=wh1.astype(compute_dtype),
                wh2=wh2.astype(compute_dtype),
                biases=biases,
                dims=dict(h1=h1, h2=h2, hh=hh, out_pad=out_pad, action_size=A))


def reference_forward(state, params, compute_dtype=jnp.float32):
    """Pure-JAX reference of the same forward pass (for correctness check).

    Mirrors the kernel's numeric path: matmul operands in `compute_dtype`,
    accumulation / biases / softmax in f32."""
    def mm(x, w):
        return jnp.dot(x.astype(compute_dtype), w.astype(compute_dtype),
                       preferred_element_type=jnp.float32)

    h = jnp.maximum(mm(state, params["w1"]) + params["b1"], 0.0)
    h = jnp.maximum(mm(h, params["w2"]) + params["b2"], 0.0)
    a = jnp.maximum(mm(h, params["wa1"]) + params["ba1"], 0.0)
    probs = jax.nn.softmax(mm(a, params["wa2"]) + params["ba2"], axis=-1)
    c = jnp.maximum(mm(h, params["wc1"]) + params["bc1"], 0.0)
    value = mm(c, params["wc2"]) + params["bc2"]
    return probs, value


if __name__ == "__main__":
    # Small shapes consistent with the module (hidden_sizes scaled down).
    batch = 8
    state_size = 32
    action_size = 8
    hidden_sizes = [128, 128]          # actor/critic hidden = 64

    key = jax.random.PRNGKey(0)
    k_state, k_params, k_bias = jax.random.split(key, 3)
    state = jax.random.normal(k_state, (batch, state_size), dtype=jnp.float32)
    params = init_params(k_params, state_size, action_size, hidden_sizes)

    # Module init zeros the biases; perturb them here so the bias path is exercised
    # by the correctness check (forward semantics are unchanged).
    bkeys = jax.random.split(k_bias, 6)
    for i, name in enumerate(["b1", "b2", "ba1", "ba2", "bc1", "bc2"]):
        params[name] = 0.1 * jax.random.normal(bkeys[i], params[name].shape, jnp.float32)

    packed = pack_params(params, action_size)   # bf16 weights, f32 biases

    probs, value = jax.block_until_ready(ppo_forward(state, packed))
    probs_ref, value_ref = reference_forward(state, params, compute_dtype=jnp.bfloat16)

    assert probs.shape == (batch, action_size)
    assert value.shape == (batch, 1)
    np.testing.assert_allclose(np.asarray(value), np.asarray(value_ref), rtol=5e-3, atol=5e-3)
    np.testing.assert_allclose(np.asarray(probs), np.asarray(probs_ref), rtol=5e-3, atol=5e-3)
    # Exact reciprocal in the softmax -> rows sum to 1 within f32 rounding.
    np.testing.assert_allclose(np.asarray(probs).sum(-1), np.ones(batch), rtol=1e-3, atol=1e-3)

    print("KERNEL_OK")
</pallas_src>

<mosaic_0001>
module attributes {stable_mosaic.version = 11 : i64} {
  func.func @_ppo_kernel(%arg0: i32, %arg1: memref<16x32xbf16, #tpu.memory_space<vmem>>, %arg2: memref<32x128xbf16, #tpu.memory_space<vmem>>, %arg3: memref<128x128xbf16, #tpu.memory_space<vmem>>, %arg4: memref<128x128xbf16, #tpu.memory_space<vmem>>, %arg5: memref<128x128xbf16, #tpu.memory_space<vmem>>, %arg6: memref<4x128xf32, #tpu.memory_space<vmem>>, %arg7: memref<16x128xf32, #tpu.memory_space<vmem>>) attributes {dimension_semantics = [#tpu.dimension_semantics<parallel>], iteration_bounds = array<i64: 1>, scalar_prefetch = 0 : i64, scratch_operands = 0 : i64, tpu.core_type = #tpu.core_type<tc>, window_params = [{transform_indices = @transform_0, window_bounds = array<i64: 16, 32>}, {pipeline_mode = #tpu.pipeline_mode<synchronous>, transform_indices = @transform_1, window_bounds = array<i64: 32, 128>}, {pipeline_mode = #tpu.pipeline_mode<synchronous>, transform_indices = @transform_2, window_bounds = array<i64: 128, 128>}, {pipeline_mode = #tpu.pipeline_mode<synchronous>, transform_indices = @transform_3, window_bounds = array<i64: 128, 128>}, {pipeline_mode = #tpu.pipeline_mode<synchronous>, transform_indices = @transform_4, window_bounds = array<i64: 128, 128>}, {pipeline_mode = #tpu.pipeline_mode<synchronous>, transform_indices = @transform_5, window_bounds = array<i64: 4, 128>}, {transform_indices = @transform_6, window_bounds = array<i64: 16, 128>}]} {
    %c0 = arith.constant 0 : index
    %c0_0 = arith.constant 0 : index
    %0 = vector.load %arg1[%c0, %c0_0] : memref<16x32xbf16, #tpu.memory_space<vmem>>, vector<16x32xbf16>
    %c0_1 = arith.constant 0 : index
    %c0_2 = arith.constant 0 : index
    %1 = vector.load %arg6[%c0_1, %c0_2] : memref<4x128xf32, #tpu.memory_space<vmem>>, vector<4x128xf32>
    %2 = vector.extract_strided_slice %1 {offsets = [0, 0], sizes = [1, 128], strides = [1, 1]} : vector<4x128xf32> to vector<1x128xf32>
    %3 = vector.extract_strided_slice %1 {offsets = [1, 0], sizes = [1, 128], strides = [1, 1]} : vector<4x128xf32> to vector<1x128xf32>
    %4 = vector.extract_strided_slice %1 {offsets = [2, 0], sizes = [1, 128], strides = [1, 1]} : vector<4x128xf32> to vector<1x128xf32>
    %5 = vector.extract_strided_slice %1 {offsets = [3, 0], sizes = [1, 128], strides = [1, 1]} : vector<4x128xf32> to vector<1x128xf32>
    %c0_3 = arith.constant 0 : index
    %c0_4 = arith.constant 0 : index
    %6 = vector.load %arg2[%c0_3, %c0_4] : memref<32x128xbf16, #tpu.memory_space<vmem>>, vector<32x128xbf16>
    %cst = arith.constant dense<0.000000e+00> : vector<16x128xf32>
    %7 = tpu.matmul %0, %6, %cst {dimension_numbers = #tpu.dot_dimension_numbers<[1], [0], [0], [1], [0, 0, 1, 1], [], []>} : vector<16x32xbf16>, vector<32x128xbf16>, vector<16x128xf32> -> vector<16x128xf32>
    %8 = vector.broadcast %2 : vector<1x128xf32> to vector<16x128xf32>
    %9 = arith.addf %7, %8 : vector<16x128xf32>
    %cst_5 = arith.constant 0.000000e+00 : f32
    %10 = vector.broadcast %cst_5 : f32 to vector<16x128xf32>
    %11 = arith.maximumf %9, %10 : vector<16x128xf32>
    %12 = arith.truncf %11 : vector<16x128xf32> to vector<16x128xbf16>
    %c0_6 = arith.constant 0 : index
    %c0_7 = arith.constant 0 : index
    %13 = vector.load %arg3[%c0_6, %c0_7] : memref<128x128xbf16, #tpu.memory_space<vmem>>, vector<128x128xbf16>
    %cst_8 = arith.constant dense<0.000000e+00> : vector<16x128xf32>
    %14 = tpu.matmul %12, %13, %cst_8 {dimension_numbers = #tpu.dot_dimension_numbers<[1], [0], [0], [1], [0, 0, 1, 1], [], []>} : vector<16x128xbf16>, vector<128x128xbf16>, vector<16x128xf32> -> vector<16x128xf32>
    %15 = vector.broadcast %3 : vector<1x128xf32> to vector<16x128xf32>
    %16 = arith.addf %14, %15 : vector<16x128xf32>
    %cst_9 = arith.constant 0.000000e+00 : f32
    %17 = vector.broadcast %cst_9 : f32 to vector<16x128xf32>
    %18 = arith.maximumf %16, %17 : vector<16x128xf32>
    %19 = arith.truncf %18 : vector<16x128xf32> to vector<16x128xbf16>
    %c0_10 = arith.constant 0 : index
    %c0_11 = arith.constant 0 : index
    %20 = vector.load %arg4[%c0_10, %c0_11] : memref<128x128xbf16, #tpu.memory_space<vmem>>, vector<128x128xbf16>
    %cst_12 = arith.constant dense<0.000000e+00> : vector<16x128xf32>
    %21 = tpu.matmul %19, %20, %cst_12 {dimension_numbers = #tpu.dot_dimension_numbers<[1], [0], [0], [1], [0, 0, 1, 1], [], []>} : vector<16x128xbf16>, vector<128x128xbf16>, vector<16x128xf32> -> vector<16x128xf32>
    %22 = vector.broadcast %4 : vector<1x128xf32> to vector<16x128xf32>
    %23 = arith.addf %21, %22 : vector<16x128xf32>
    %cst_13 = arith.constant 0.000000e+00 : f32
    %24 = vector.broadcast %cst_13 : f32 to vector<16x128xf32>
    %25 = arith.maximumf %23, %24 : vector<16x128xf32>
    %26 = arith.truncf %25 : vector<16x128xf32> to vector<16x128xbf16>
    %c0_14 = arith.constant 0 : index
    %c0_15 = arith.constant 0 : index
    %27 = vector.load %arg5[%c0_14, %c0_15] : memref<128x128xbf16, #tpu.memory_space<vmem>>, vector<128x128xbf16>
    %cst_16 = arith.constant dense<0.000000e+00> : vector<16x128xf32>
    %28 = tpu.matmul %26, %27, %cst_16 {dimension_numbers = #tpu.dot_dimension_numbers<[1], [0], [0], [1], [0, 0, 1, 1], [], []>} : vector<16x128xbf16>, vector<128x128xbf16>, vector<16x128xf32> -> vector<16x128xf32>
    %29 = vector.broadcast %5 : vector<1x128xf32> to vector<16x128xf32>
    %30 = arith.addf %28, %29 : vector<16x128xf32>
    %31 = tpu.iota {dimensions = array<i32: 1>} : vector<16x128xi32>
    %c8_i32 = arith.constant 8 : i32
    %32 = vector.broadcast %c8_i32 : i32 to vector<16x128xi32>
    %33 = arith.cmpi slt, %31, %32 : vector<16x128xi32>
    %cst_17 = arith.constant 0xFF800000 : f32
    %34 = vector.broadcast %cst_17 : f32 to vector<16x128xf32>
    %35 = arith.select %33, %30, %34 : vector<16x128xi1>, vector<16x128xf32>
    %cst_18 = arith.constant dense<0xFF800000> : vector<16xf32>
    %36 = vector.multi_reduction <maximumf>, %35, %cst_18 [1] : vector<16x128xf32> to vector<16xf32>
    %37 = vector.shape_cast %36 : vector<16xf32> to vector<16x1xf32>
    %38 = vector.broadcast %37 : vector<16x1xf32> to vector<16x128xf32>
    %39 = arith.subf %35, %38 : vector<16x128xf32>
    %40 = math.exp %39 : vector<16x128xf32>
    %cst_19 = arith.constant dense<0.000000e+00> : vector<16xf32>
    %41 = vector.multi_reduction <add>, %40, %cst_19 [1] : vector<16x128xf32> to vector<16xf32>
    %42 = vector.shape_cast %41 : vector<16xf32> to vector<16x1xf32>
    %43 = tpu.reciprocal %42 : vector<16x1xf32> -> vector<16x1xf32>
    %44 = vector.broadcast %43 : vector<16x1xf32> to vector<16x128xf32>
    %45 = arith.mulf %40, %44 : vector<16x128xf32>
    %c8_i32_20 = arith.constant 8 : i32
    %46 = vector.broadcast %c8_i32_20 : i32 to vector<16x128xi32>
    %47 = arith.cmpi eq, %31, %46 : vector<16x128xi32>
    %48 = arith.select %47, %30, %45 : vector<16x128xi1>, vector<16x128xf32>
    %c0_21 = arith.constant 0 : index
    %c0_22 = arith.constant 0 : index
    %49 = vector.load %arg7[%c0_21, %c0_22] : memref<16x128xf32, #tpu.memory_space<vmem>>, vector<16x128xf32>
    tpu.vector_store %arg7[%c0_21, %c0_22], %48 {strides = array<i32>} : memref<16x128xf32, #tpu.memory_space<vmem>>, vector<16x128xf32>,
    return
  }
  func.func @transform_0(%arg0: i32) -> (i32, i32) {
    %c0_i32 = arith.constant 0 : i32
    %c0_i32_0 = arith.constant 0 : i32
    return %arg0, %c0_i32 : i32, i32
  }
  func.func @transform_1(%arg0: i32) -> (i32, i32) {
    %c0_i32 = arith.constant 0 : i32
    %c0_i32_0 = arith.constant 0 : i32
    %c0_i32_1 = arith.constant 0 : i32
    return %c0_i32, %c0_i32_0 : i32, i32
  }
  func.func @transform_2(%arg0: i32) -> (i32, i32) {
    %c0_i32 = arith.constant 0 : i32
    %c0_i32_0 = arith.constant 0 : i32
    %c0_i32_1 = arith.constant 0 : i32
    return %c0_i32, %c0_i32_0 : i32, i32
  }
  func.func @transform_3(%arg0: i32) -> (i32, i32) {
    %c0_i32 = arith.constant 0 : i32
    %c0_i32_0 = arith.constant 0 : i32
    %c0_i32_1 = arith.constant 0 : i32
    return %c0_i32, %c0_i32_0 : i32, i32
  }
  func.func @transform_4(%arg0: i32) -> (i32, i32) {
    %c0_i32 = arith.constant 0 : i32
    %c0_i32_0 = arith.constant 0 : i32
    %c0_i32_1 = arith.constant 0 : i32
    return %c0_i32, %c0_i32_0 : i32, i32
  }
  func.func @transform_5(%arg0: i32) -> (i32, i32) {
    %c0_i32 = arith.constant 0 : i32
    %c0_i32_0 = arith.constant 0 : i32
    %c0_i32_1 = arith.constant 0 : i32
    return %c0_i32, %c0_i32_0 : i32, i32
  }
  func.func @transform_6(%arg0: i32) -> (i32, i32) {
    %c0_i32 = arith.constant 0 : i32
    %c0_i32_0 = arith.constant 0 : i32
    return %arg0, %c0_i32 : i32, i32
  }
}

</mosaic_0001>

<bundles_post_ra>
// kernel: tpu_custom_call.1
= control target key start
LH: loop header
LB: loop body
LE: loop exit
PB: predicated region body
PF: predicated region fallthrough
CT: control target
= control target key end

     0   :  { %11 = vsyncpa [#allocation3], 0  ;;  %s847_s0 = inlined_call_operand.hbm [shape: bf16[16,32], index: 0, kind: input, shape index: {}]   ;;  %s848_s1 = inlined_call_operand.hbm [shape: bf16[32,128], index: 1, kind: input, shape index: {}]   ;;  %s849_s2 = inlined_call_operand.hbm [shape: bf16[128,128], index: 2, kind: input, shape index: {}]   ;;  %s850_s3 = inlined_call_operand.hbm [shape: bf16[128,128], index: 3, kind: input, shape index: {}]   ;;  %s851_s4 = inlined_call_operand.hbm [shape: bf16[128,128], index: 4, kind: input, shape index: {}]   ;;  %s852_s5 = inlined_call_operand.vmem [shape: f32[4,128], index: 5, kind: input, shape index: {}]   ;;  %s853_s6 = inlined_call_operand.hbm [shape: f32[16,128], index: 6, kind: output, shape index: {}]  }
   0x1   :  { %12 = vsyncpa [#allocation6], 0 }
   0x2   :  { %13 = vsyncpa [#allocation9], 0 }
   0x3   :  { %14 = vsyncpa [#allocation4], 0  ;;  %s32_s23 = sshll.u32 %s848_s1, 4  ;;  %s773_s24 = smov [#allocation5]   ;;  %s33_s23 = int_to_ptr.hbm [resolvable:$true] %s32_s23 }
   0x4   :  { %s34_s25 = sshll.u32 %s773_s24, 4  ;;  %s58_s28 = sshll.u32 %s850_s3, 4  ;;  %s35_s25 = int_to_ptr.vmem [resolvable:$true] %s34_s25  ;;  %s59_s28 = int_to_ptr.hbm [resolvable:$true] %s58_s28 }
   0x5   :  { %s774_s29 = smov 64   ;;  %s775_s30 = smov 4  }
   0x6   :  { %40 = dma.hbm_to_vmem [thread:$0]  %s33_s23, 256, %s35_s25, [#allocation6], %s774_s29, %s774_s29, %s775_s30  }
   0x7   :  { %s776_s7 = smov [#allocation8]   ;;  %s19_s11 = sshll.u32 %s847_s0, 4  ;;  %s20_s11 = int_to_ptr.hbm [resolvable:$true] %s19_s11 }
   0x8   :  { %s60_s8 = sshll.u32 %s776_s7, 4  ;;  %s45_s13 = sshll.u32 %s849_s2, 4  ;;  %s61_s8 = int_to_ptr.vmem [resolvable:$true] %s60_s8  ;;  %s46_s13 = int_to_ptr.hbm [resolvable:$true] %s45_s13 }
   0x9   :  { %66 = dma.hbm_to_vmem [thread:$0]  %s59_s28, 1024, %s61_s8, [#allocation9], %s774_s29, %s774_s29, %s775_s30  }
   0xa   :  { %s777_s14 = smov [#allocation2]   ;;  %s778_s3 = smov [#allocation7]  }
   0xb   :  { %s21_s15 = sshll.u32 %s777_s14, 4  ;;  %s47_s16 = sshll.u32 %s778_s3, 4  ;;  %s22_s15 = int_to_ptr.vmem [resolvable:$true] %s21_s15  ;;  %s48_s16 = int_to_ptr.vmem [resolvable:$true] %s47_s16 }
   0xc   :  { %27 = dma.hbm_to_vmem [thread:$0]  %s20_s11, 128, %s22_s15, [#allocation3], %s774_s29, %s774_s29, %s775_s30  }
   0xd   :  { %s71_s19 = sshll.u32 %s851_s4, 4  ;;  %s779_s0 = smov [#allocation10]   ;;  %s72_s19 = int_to_ptr.hbm [resolvable:$true] %s71_s19 }
   0xe   :  { %53 = dma.hbm_to_vmem [thread:$0]  %s46_s13, 1024, %s48_s16, [#allocation6], %s774_s29, %s774_s29, %s775_s30  }
   0xf   :  { %s73_s20 = sshll.u32 %s779_s0, 4  ;;  %s74_s20 = int_to_ptr.vmem [resolvable:$true] %s73_s20 }
  0x10   :  { %79 = dma.hbm_to_vmem [thread:$0]  %s72_s19, 1024, %s74_s20, [#allocation9], %s774_s29, %s774_s29, %s775_s30  }
  0x11   :  { %765 = dma.done.wait [#allocation3], 128  }
  0x12   :  { %766 = vsyncadd [#allocation3], 4294967168 }
  0x13   :  { %767 = dma.done.wait [#allocation6], 1280  }
  0x14   :  { %768 = vsyncadd [#allocation6], 4294966016 }
  0x15   :  { %769 = dma.done.wait [#allocation9], 2048  }
  0x16   :  { %770 = vsyncadd [#allocation9], 4294965248  ;;  %v578_v0 = vld [vmem:[#allocation5 + $0x8] sm:$0xff]  ;;  %v577_v2 = vld [vmem:[#allocation5] sm:$0xff]  ;;  %vm128_vm0 = vcmask 261120   ;;  %v392_v52 = vlaneseq  ;;  %s452_s24 = sshll.u32 %s853_s6, 4  ;;  %s453_s24 = int_to_ptr.hbm [resolvable:$true] %s452_s24 }
  0x17   :  { %v586_v1 = vld [vmem:[#allocation7 + $0x38] sm:$0xff]  ;;  %138 = vmatpush.bf16.msra.mxu0 %v578_v0  ;;  %v585_v3 = vld [vmem:[#allocation7 + $0x30] sm:$0xff]  ;;  %v576_v4 = vld [vmem:[#allocation2] sm:$0xff]  ;;  %s781_s25 = smov 128   ;;  %s782_s26 = smov 8  }
  0x18   :  { %214 = vmatpush.bf16.msra.mxu1 %v586_v1  ;;  %v584_v5 = vld [vmem:[#allocation7 + $0x28] sm:$0xff]  ;;  %v583_v6 = vld [vmem:[#allocation7 + $0x20] sm:$0xff]  ;;  %v582_v7 = vld [vmem:[#allocation7 + $0x18] sm:$0xff]  ;;  %v836_v53 = vand.u32 127, %v392_v52 }
  0x19   :  { %v581_v8 = vld [vmem:[#allocation7 + $0x10] sm:$0xff]  ;;  %v580_v9 = vld [vmem:[#allocation7 + $0x8] sm:$0xff]  ;;  %v579_v10 = vld [vmem:[#allocation7] sm:$0xff] }
  0x1a   :  { %v594_v11 = vld [vmem:[#allocation8 + $0x38] sm:$0xff]  ;;  %v593_v12 = vld [vmem:[#allocation8 + $0x30] sm:$0xff]  ;;  %v592_v13 = vld [vmem:[#allocation8 + $0x28] sm:$0xff]  ;;  %vm394_vm1 = vcmp.lt.s32.totalorder %v836_v53, 8  ;;  %vm441_vm6 = vcmp.eq.s32.totalorder %v836_v53, 8 }
  0x1b   :  { %139 = vmatpush.bf16.msra.mxu0 %v577_v2  ;;  %296 = vmatpush.bf16.msra.mxu2 %v594_v11  ;;  %v591_v14 = vld [vmem:[#allocation8 + $0x20] sm:$0xff]  ;;  %v105_v15 = vld [vmem:[%s852_s5] sm:$0xf]  ;;  %v590_v24 = vld [vmem:[#allocation8 + $0x18] sm:$0xff]  ;;  %s780_s5 = smov [#allocation11]  }
  0x1c   :  { %215 = vmatpush.bf16.msra.mxu1 %v585_v3  ;;  %v110_v17 = vperm.slane %v105_v15, 0  ;;  %v589_v25 = vld [vmem:[#allocation8 + $0x10] sm:$0xff]  ;;  %v588_v26 = vld [vmem:[#allocation8 + $0x8] sm:$0xff]  ;;  %v587_v27 = vld [vmem:[#allocation8] sm:$0xff]  ;;  %v165_v33 = vperm.slane %v105_v15, 1  ;;  %v247_v45 = vperm.slane %v105_v15, 2 }
  0x1d   :  { %v602_v28 = vld [vmem:[#allocation10 + $0x38] sm:$0xff]  ;;  %v601_v29 = vld [vmem:[#allocation10 + $0x30] sm:$0xff]  ;;  %v600_v30 = vld [vmem:[#allocation10 + $0x28] sm:$0xff]  ;;  %v329_v54 = vperm.slane %v105_v15, 3  ;;  %s450_s21 = sshll.u32 %s780_s5, 4  ;;  %s451_s21 = int_to_ptr.vmem [resolvable:$true] %s450_s21 }
  0x1e   :  { %479 = vmatmul.msk.bf16.vlgmr.msra.gmra.mxu0 %vm128_vm0, %v576_v4  ;;  %378 = vmatpush.bf16.msra.mxu3 %v602_v28  ;;  %v599_v31 = vld [vmem:[#allocation10 + $0x20] sm:$0xff]  ;;  %v598_v40 = vld [vmem:[#allocation10 + $0x18] sm:$0xff]  ;;  %v597_v41 = vld [vmem:[#allocation10 + $0x10] sm:$0xff] }
  0x1f   :  { %297 = vmatpush.bf16.msra.mxu2 %v593_v12  ;;  %v596_v42 = vld [vmem:[#allocation10 + $0x8] sm:$0xff]  ;;  %v595_v43 = vld [vmem:[#allocation10] sm:$0xff] }
  0x20   :  { %216 = vmatpush.bf16.msra.mxu1 %v584_v5 }
  0x22   :  { %379 = vmatpush.bf16.msra.mxu3 %v601_v29 }
  0x23   :  { %298 = vmatpush.bf16.msra.mxu2 %v592_v13 }
  0x24   :  { %217 = vmatpush.bf16.msra.mxu1 %v583_v6 }
  0x26   :  { %380 = vmatpush.bf16.msra.mxu3 %v600_v30 }
  0x27   :  { %299 = vmatpush.bf16.msra.mxu2 %v591_v14 }
  0x28   :  { %218 = vmatpush.bf16.msra.mxu1 %v582_v7 }
  0x2a   :  { %381 = vmatpush.bf16.msra.mxu3 %v599_v31 }
  0x2b   :  { %300 = vmatpush.bf16.msra.mxu2 %v590_v24 }
  0x2c   :  { %219 = vmatpush.bf16.msra.mxu1 %v581_v8 }
  0x2e   :  { %382 = vmatpush.bf16.msra.mxu3 %v598_v40 }
  0x2f   :  { %301 = vmatpush.bf16.msra.mxu2 %v589_v25 }
  0x30   :  { %220 = vmatpush.bf16.msra.mxu1 %v580_v9 }
  0x32   :  { %383 = vmatpush.bf16.msra.mxu3 %v597_v41 }
  0x33   :  { %302 = vmatpush.bf16.msra.mxu2 %v588_v26 }
  0x34   :  { %221 = vmatpush.bf16.msra.mxu1 %v579_v10 }
  0x36   :  { %384 = vmatpush.bf16.msra.mxu3 %v596_v42 }
  0x37   :  { %303 = vmatpush.bf16.msra.mxu2 %v587_v27 }
  0x3a   :  { %385 = vmatpush.bf16.msra.mxu3 %v595_v43 }
  0x9b   :  { %v141_v16 = vpop.f32.mrf.mxu0 }
  0x9c   :  { %v142_v18 = vadd.f32 %v141_v16, %v110_v17 }
  0x9e   :  { %v146_v21 = vmax.f32 %v142_v18, 0.0 }
  0xa3   :  { %v143_v19 = vpop.f32.mrf.mxu0 }
  0xa4   :  { %v144_v20 = vadd.f32 %v143_v19, %v110_v17 }
  0xa6   :  { %v147_v22 = vmax.f32 %v144_v20, 0.0 }
  0xa8   :  { %v148_v23 = vpack.c.bf16 %v147_v22, %v146_v21 }
  0xaa   :  { %222 = vmatmul.bf16.vlgmr.msra.gmra.mxu1 %v148_v23 }
 0x127   :  { %v223_v32 = vpop.f32.mrf.mxu1 }
 0x128   :  { %v224_v34 = vadd.f32 %v223_v32, %v165_v33 }
 0x12a   :  { %v228_v37 = vmax.f32 %v224_v34, 0.0 }
 0x12f   :  { %v225_v35 = vpop.f32.mrf.mxu1 }
 0x130   :  { %v226_v36 = vadd.f32 %v225_v35, %v165_v33 }
 0x132   :  { %v229_v38 = vmax.f32 %v226_v36, 0.0 }
 0x134   :  { %v230_v39 = vpack.c.bf16 %v229_v38, %v228_v37 }
 0x136   :  { %304 = vmatmul.bf16.vlgmr.msra.gmra.mxu2 %v230_v39 }
 0x1b9   :  { %v305_v44 = vpop.f32.mrf.mxu2 }
 0x1ba   :  { %v306_v46 = vadd.f32 %v305_v44, %v247_v45 }
 0x1bc   :  { %v310_v49 = vmax.f32 %v306_v46, 0.0 }
 0x1c1   :  { %v307_v47 = vpop.f32.mrf.mxu2 }
 0x1c2   :  { %v308_v48 = vadd.f32 %v307_v47, %v247_v45 }
 0x1c4   :  { %v311_v50 = vmax.f32 %v308_v48, 0.0 }
 0x1c6   :  { %v312_v51 = vpack.c.bf16 %v311_v50, %v310_v49 }
 0x1c8   :  { %386 = vmatmul.bf16.vlgmr.msra.gmra.mxu3 %v312_v51 }
 0x24b   :  { %v387_v55 = vpop.f32.mrf.mxu3 }
 0x24c   :  { %v388_v56 = vadd.f32 %v387_v55, %v329_v54 }
 0x24e   :  { %v395_v57 = vsel %vm394_vm1, %v388_v56, -inf }
 0x24f   :  { %397 = vmax.xlane.f32.xlu0 %v395_v57 }
 0x253   :  { %v389_v58 = vpop.f32.mrf.mxu3 }
 0x254   :  { %v390_v59 = vadd.f32 %v389_v58, %v329_v54 }
 0x256   :  { %v396_v60 = vsel %vm394_vm1, %v390_v59, -inf }
 0x257   :  { %399 = vmax.xlane.f32.xlu0 %v396_v60 }
 0x2c2   :  { %v398_v61 = vpop.xlane.xlu0 %397 }
 0x2c3   :  { %v401_v62 = vsub.f32 %v395_v57, %v398_v61 }
 0x2c5   :  { %v403_v63 = vmul.f32 1.442695, %v401_v62 }
 0x2c7   :  { %613 = vpow2.f32 %v403_v63 }
 0x2ca   :  { %v400_v0 = vpop.xlane.xlu0 %399 }
 0x2cb   :  { %v402_v1 = vsub.f32 %v396_v60, %v400_v0 }
 0x2cd   :  { %v614_v2 = vpop.eup %613  ;;  %v405_v3 = vmul.f32 1.442695, %v402_v1 }
 0x2ce   :  { %407 = vadd.xlane.f32.xlu1 %v614_v2 }
 0x2cf   :  { %615 = vpow2.f32 %v405_v3 }
 0x2d5   :  { %v616_v4 = vpop.eup %615 }
 0x2d6   :  { %409 = vadd.xlane.f32.xlu1 %v616_v4 }
 0x341   :  { %v408_v5 = vpop.xlane.xlu1 %407 }
 0x342   :  { %617 = vrcp.f32 %v408_v5  ;;  %v422_v10 = vand.u32 2147483648, %v408_v5  ;;  %v420_v12 = vand.u32 2147483647, %v408_v5  ;;  %vm416_vm3 = vweird.f32 %v408_v5 }
 0x344   :  { %v423_v15 = vor.u32 1.1754944e-38, %v422_v10  ;;  %vm421_vm5 = vcmp.eq.f32.partialorder %v420_v12, 8.507059e+37 }
 0x348   :  { %v618_v6 = vpop.eup %617 }
 0x349   :  { %v412_v7 = vmul.f32 %v618_v6, %v408_v5  ;;  %v410_v8 = vpop.xlane.xlu1 %409  ;;  %vm417_vm2 = vweird.f32 %v618_v6 }
 0x34a   :  { %619 = vrcp.f32 %v410_v8  ;;  %vm418_vm4 = vmor %vm416_vm3, %vm417_vm2  ;;  %v436_v21 = vand.u32 2147483648, %v410_v8  ;;  %v434_v23 = vand.u32 2147483647, %v410_v8  ;;  %vm430_vm8 = vweird.f32 %v410_v8 }
 0x34b   :  { %v413_v9 = vsub.f32 1.0, %v412_v7 }
 0x34c   :  { %v437_v26 = vor.u32 1.1754944e-38, %v436_v21  ;;  %vm435_vm10 = vcmp.eq.f32.partialorder %v434_v23, 8.507059e+37 }
 0x34d   :  { %v414_v11 = vmul.f32 %v618_v6, %v413_v9 }
 0x34f   :  { %v415_v13 = vadd.f32 %v618_v6, %v414_v11 }
 0x350   :  { %v620_v14 = vpop.eup %619 }
 0x351   :  { %v419_v16 = vsel %vm418_vm4, %v618_v6, %v415_v13  ;;  %v426_v17 = vmul.f32 %v620_v14, %v410_v8  ;;  %vm431_vm7 = vweird.f32 %v620_v14 }
 0x352   :  { %v424_v18 = vsel %vm421_vm5, %v423_v15, %v419_v16  ;;  %vm432_vm9 = vmor %vm430_vm8, %vm431_vm7 }
 0x353   :  { %v439_v19 = vmul.f32 %v614_v2, %v424_v18  ;;  %v427_v20 = vsub.f32 1.0, %v426_v17 }
 0x355   :  { %v428_v22 = vmul.f32 %v620_v14, %v427_v20  ;;  %v442_v24 = vsel %vm441_vm6, %v388_v56, %v439_v19 }
 0x356   :  { %444 = vst [vmem:[#allocation11] sm:$0xff] %v442_v24 }
 0x357   :  { %v429_v25 = vadd.f32 %v620_v14, %v428_v22 }
 0x359   :  { %v433_v27 = vsel %vm432_vm9, %v620_v14, %v429_v25 }
 0x35a   :  { %v438_v28 = vsel %vm435_vm10, %v437_v26, %v433_v27 }
 0x35b   :  { %v440_v29 = vmul.f32 %v616_v4, %v438_v28 }
 0x35d   :  { %v443_v30 = vsel %vm441_vm6, %v390_v59, %v440_v29 }
 0x35e   :  { %445 = vst [vmem:[#allocation11 + $0x8] sm:$0xff] %v443_v30 }
 0x35f   :  { %458 = dma.vmem_to_hbm [thread:$0]  %s451_s21, 256, %s453_s24, [#allocation4], %s781_s25, %s781_s25, %s782_s26  }
 0x360   :  { %771 = dma.done.wait [#allocation4], 256  }
 0x361   :  { %772 = vsyncadd [#allocation4], 4294967040 }
 0x362   :  { %463 = vsyncpa [#allocation3], 1 }
 0x363   :  { %464 = vsyncpa [#allocation6], 1 }
 0x364   :  { %465 = vsyncpa [#allocation9], 1 }
 0x365   :  { %466 = vsyncpa [#allocation4], 1 }

</bundles_post_ra>
